<compile_context>
chip_gen: v6e
topology: v6e:2x2x1
jax: 0.10.0
libtpu: 0.0.40
codegen_flags: <defaults>
</compile_context>

<pallas_src>
import math

import jax
import jax.numpy as jnp
from jax.experimental import pallas as pl
from jax.experimental.pallas import tpu as pltpu


def _make_drop_path_kernel(inv_keep_prob: float):
    def drop_path_kernel(keep_ref, x_ref, o_ref):
        # keep_ref: (N,) int32 in SMEM (scalar prefetch; 0/1 per sample)
        # x_ref / o_ref: (1, row_block, lanes) VMEM tiles (lane-dense)
        n = pl.program_id(0)
        scale = keep_ref[n].astype(jnp.float32) * inv_keep_prob
        o_ref[...] = (x_ref[...] * scale).astype(o_ref.dtype)
    return drop_path_kernel


def _pick_row_block(rows: int, max_rows: int = 2048) -> int:
    """Largest multiple-of-8 divisor of `rows` that is <= max_rows (else rows)."""
    if rows <= max_rows:
        return rows
    start = max_rows - (max_rows % 8)
    for cand in range(start, 7, -8):
        if rows % cand == 0:
            return cand
    return rows  # pathological (e.g. huge prime); fall back to full extent


def drop_path_pallas(x, drop_prob: float, training: bool, key):
    """DropPath forward. x: (N, ...) float. Returns array of x.shape/dtype."""
    if drop_prob == 0.0 or not training:
        return x                                    # PyTorch short-circuit

    N = x.shape[0]
    keep_prob = 1.0 - float(drop_prob)

    # Per-sample Bernoulli(keep_prob), exactly the PyTorch recipe:
    # floor(keep_prob + U[0,1)).  Drawn with jax.random for determinism.
    # TODO(synk): could be moved in-kernel via pltpu.prng_seed/prng_random_bits.
    u = jax.random.uniform(key, (N,), dtype=jnp.float32)
    keep = jnp.floor(keep_prob + u).astype(jnp.int32)       # (N,) in {0, 1}

    total = math.prod(x.shape[1:]) if x.ndim > 1 else 1
    if total % 128 == 0:
        rows, lanes = total // 128, 128             # lane-dense, (8,128)-tileable
    else:
        rows, lanes = 1, total                      # full-extent block fallback
    xr = x.reshape(N, rows, lanes)                  # pure reshape, no transpose

    row_block = _pick_row_block(rows)
    grid = (N, rows // row_block)

    out = pl.pallas_call(
        _make_drop_path_kernel(1.0 / keep_prob),
        out_shape=jax.ShapeDtypeStruct((N, rows, lanes), x.dtype),
        grid_spec=pltpu.PrefetchScalarGridSpec(
            num_scalar_prefetch=1,                  # `keep` lands in SMEM
            grid=grid,
            in_specs=[pl.BlockSpec((1, row_block, lanes),
                                   lambda n, r, keep: (n, r, 0))],
            out_specs=pl.BlockSpec((1, row_block, lanes),
                                   lambda n, r, keep: (n, r, 0)),
        ),
        compiler_params=pltpu.CompilerParams(
            dimension_semantics=("parallel", "parallel")),
    )(keep, xr)

    return out.reshape(x.shape)


def ref_drop_path(x, drop_prob, training, key):
    """Pure-JAX reference mirroring the PyTorch formula (same RNG draw)."""
    if drop_prob == 0.0 or not training:
        return x
    keep_prob = 1.0 - drop_prob
    u = jax.random.uniform(key, (x.shape[0],), dtype=jnp.float32)
    random_tensor = jnp.floor(keep_prob + u).astype(x.dtype)
    bshape = (x.shape[0],) + (1,) * (x.ndim - 1)
    return x / keep_prob * random_tensor.reshape(bshape)


if __name__ == "__main__":
    drop_prob = 0.25
    key = jax.random.PRNGKey(0)
    kx, kdrop, kx2 = jax.random.split(key, 3)

    # Main test: (N, C, H, W) = (2, 4, 16, 16) -> 1024 elems/sample (lane-dense path).
    x = jax.random.normal(kx, (2, 4, 16, 16), jnp.float32)
    out = jax.block_until_ready(drop_path_pallas(x, drop_prob, True, kdrop))
    ref = jax.block_until_ready(ref_drop_path(x, drop_prob, True, kdrop))
    assert out.shape == x.shape and out.dtype == x.dtype
    assert jnp.allclose(out, ref, atol=1e-5, rtol=1e-5), \
        float(jnp.max(jnp.abs(out - ref)))

    # Ragged fallback path: per-sample size not a multiple of 128.
    x2 = jax.random.normal(kx2, (2, 3, 5, 7), jnp.float32)
    out2 = jax.block_until_ready(drop_path_pallas(x2, drop_prob, True, kdrop))
    ref2 = jax.block_until_ready(ref_drop_path(x2, drop_prob, True, kdrop))
    assert jnp.allclose(out2, ref2, atol=1e-5, rtol=1e-5)

    # Eval / drop_prob==0 path is the identity (PyTorch short-circuit).
    out_eval = jax.block_until_ready(drop_path_pallas(x, drop_prob, False, kdrop))
    assert jnp.array_equal(out_eval, x)
    out_p0 = jax.block_until_ready(drop_path_pallas(x, 0.0, True, kdrop))
    assert jnp.array_equal(out_p0, x)

    print("KERNEL_OK")
</pallas_src>

<mosaic_0001>
module attributes {stable_mosaic.version = 11 : i64} {
  func.func @drop_path_kernel(%arg0: i32, %arg1: i32, %arg2: memref<2xi32, #tpu.memory_space<smem>>, %arg3: memref<1x8x128xf32, #tpu.memory_space<vmem>>, %arg4: memref<1x8x128xf32, #tpu.memory_space<vmem>>) attributes {dimension_semantics = [#tpu.dimension_semantics<parallel>, #tpu.dimension_semantics<parallel>], iteration_bounds = array<i64: 2, 1>, scalar_prefetch = 1 : i64, scratch_operands = 0 : i64, tpu.core_type = #tpu.core_type<tc>, window_params = [{transform_indices = @transform_0, window_bounds = array<i64: 1, 8, 128>}, {transform_indices = @transform_1, window_bounds = array<i64: 1, 8, 128>}]} {
    %0 = arith.index_cast %arg0 : i32 to index
    %1 = memref.load %arg2[%0] : memref<2xi32, #tpu.memory_space<smem>>
    %2 = arith.sitofp %1 : i32 to f32
    %cst = arith.constant 1.33333337 : f32
    %3 = arith.mulf %2, %cst : f32
    %c0 = arith.constant 0 : index
    %c0_0 = arith.constant 0 : index
    %c0_1 = arith.constant 0 : index
    %4 = vector.load %arg3[%c0, %c0_0, %c0_1] : memref<1x8x128xf32, #tpu.memory_space<vmem>>, vector<1x8x128xf32>
    %5 = vector.broadcast %3 : f32 to vector<1x8x128xf32>
    %6 = arith.mulf %4, %5 : vector<1x8x128xf32>
    %c0_2 = arith.constant 0 : index
    %c0_3 = arith.constant 0 : index
    %c0_4 = arith.constant 0 : index
    %7 = vector.load %arg4[%c0_2, %c0_3, %c0_4] : memref<1x8x128xf32, #tpu.memory_space<vmem>>, vector<1x8x128xf32>
    tpu.vector_store %arg4[%c0_2, %c0_3, %c0_4], %6 {strides = array<i32>} : memref<1x8x128xf32, #tpu.memory_space<vmem>>, vector<1x8x128xf32>,
    return
  }
  func.func @transform_0(%arg0: i32, %arg1: i32, %arg2: memref<2xi32, #tpu.memory_space<smem>>) -> (i32, i32, i32) {
    %c0_i32 = arith.constant 0 : i32
    %c0_i32_0 = arith.constant 0 : i32
    return %arg0, %arg1, %c0_i32 : i32, i32, i32
  }
  func.func @transform_1(%arg0: i32, %arg1: i32, %arg2: memref<2xi32, #tpu.memory_space<smem>>) -> (i32, i32, i32) {
    %c0_i32 = arith.constant 0 : i32
    %c0_i32_0 = arith.constant 0 : i32
    return %arg0, %arg1, %c0_i32 : i32, i32, i32
  }
}

</mosaic_0001>

<bundles_post_ra>
// kernel: tpu_custom_call.1
= control target key start
LH: loop header
LB: loop body
LE: loop exit
PB: predicated region body
PF: predicated region fallthrough
CT: control target
= control target key end

     0   :  { %s452_s9 = smov [#allocation3]   ;;  %s608_s0 = inlined_call_operand.hbm [shape: s32[2], index: 0, kind: input, shape index: {}]   ;;  %s609_s1 = inlined_call_operand.hbm [shape: f32[2,8,128], index: 1, kind: input, shape index: {}]   ;;  %s610_s2 = inlined_call_operand.hbm [shape: f32[2,8,128], index: 2, kind: output, shape index: {}]  }
   0x1   :  { %8 = dma.hbm_to_smem %s608_s0, 16, %s452_s9, [#allocation2] }
   0x2   :  { %418 = dma.done.wait [#allocation2], 16 }
   0x3   :  { %419 = vsyncadd [#allocation2], 4294967280 }
   0x4   :  { %10 = sfence }
   0x5   :  { %11 = vsyncpa [#allocation5], 0 }
   0x6   :  { %13 = vsyncpa [#allocation5 + $0x1], 0 }
   0x7   :  { %14 = vsyncpa [#allocation6], 0 }
   0x8   :  { %16 = vsyncpa [#allocation6 + $0x1], 0  ;;  %s473_s12 = smov 0   ;;  %s475_s13 = smov 0  }
   0x9   :  { %s477_s14 = smov 0   ;;  %s479_s15 = smov 0  }
   0xa   :  { %s481_s16 = smov 0   ;;  %s483_s17 = smov 0  }
   0xb LB: > { %s256_s0 = sadd.s32 4294967295, %s450_s17   ;;  %s257_s18 = sadd.s32 4294967294, %s450_s17   ;;  %s450_s17 = sphi %s483_s17, %s22_s17   ;;  %s446_s16 = sphi %s481_s16, %s622_s16   ;;  %s442_s15 = sphi %s479_s15, %s621_s15   ;;  %s438_s14 = sphi %s477_s14, %s620_s14   ;;  %s434_s13 = sphi %s475_s13, %s619_s13   ;;  %s430_s12 = sphi %s473_s12, %s618_s12  }
   0xc   : > { %s34_s19 = sadd.s32 1, %s446_s16  ;;  %s43_s20 = sadd.s32 1, %s438_s14 }
   0xd   : > { %p36_p0 = scmp.ge.s32.totalorder %s34_s19, 2  ;;  %p50_p1 = scmp.ne.s32.totalorder %s438_s14, %s434_s13 }
   0xe   : > { %p51_p2 = scmp.eq.s32.totalorder %s450_s17, 0  ;;  %p56_p3 = scmp.ne.s32.totalorder %s434_s13, %s430_s12 }
   0xf   : > { %s624_s19 = smov (%p36_p0, %s34_s19), 0  ;;  %p57_p5 = scmp.eq.s32.totalorder %s256_s0, 0 }
  0x10   : > { %p514_p4 = por %p51_p2, %p50_p1  ;;  %s38_s22 = ssub.s32 %s446_s16, %s624_s19 }
  0x11   : > { %p82_p6 = scmp.eq.s32.totalorder %s256_s0, 1  ;;  %p41_p7 = scmp.eq.s32.totalorder %s38_s22, 0 }
  0x12   : > { %p520_p8 = por %p57_p5, %p56_p3  ;;  %p88_p10 = scmp.eq.s32.totalorder %s257_s18, 1 }
  0x13   : > { %p524_p9 = por %p82_p6, %p50_p1  ;;  %p281_p13 = scmp.lt.s32.totalorder %s450_s17, 2 }
  0x14   : > { %s529_s25 = scalar_select %p41_p7, %s438_s14, %s43_s20  }
  0x15   : > { %p531_p11 = por %p88_p10, %p56_p3  ;;  %s108_s27 = sand.u32 1, %s438_s14  }
  0x16   : > { %s260_s28 = sshll.u32 %s108_s27, 3  ;;  %s261_s29 = sshll.u32 %s446_s16, 7 }
  0x17   : > { %s614_s26 = scalar_select %p531_p11, 1, 0 }
  0x18   : > { %s118_s4 = scalar_lea.hbm %s609_s1, %s261_s29  ;;  %s112_s5 = scalar_lea.vmem [#allocation4], %s260_s28 }
  0x19   : > { %s120_s6 = sshll.u32 %s112_s5, 4  ;;  %p544_p0 = pnand %p281_p13, %p514_p4  ;;  %s121_s6 = int_to_ptr.vmem [resolvable:$true] %s120_s6 }
  0x1a   : > { %p262_p1 = scmp.ge.s32.totalorder %s450_s17, 1  ;;  %p125_p2 = scmp.lt.s32.totalorder %s450_s17, 3 }
  0x1b   : > { %s109_s8 = scalar_lea.sflag [#allocation5], %s108_s27  ;;  %p342_p3 = pneg %p544_p0 }
  0x1c   : > { %s353_s9 = scalar_lea.vmem %s121_s6, 128  ;;  %s453_s10 = smov [#allocation4]  }
  0x1d   : > { %p354_p5 = scmp.ne.s32.totalorder %s121_s6, %s353_s9  ;;  %s358_s11 = sshll.u32 %s453_s10, 4  ;;  %s359_s11 = int_to_ptr.vmem [resolvable:$false] %s358_s11 }
  0x1e   : > { %s360_s0 = scalar_lea.vmem %s359_s11, 256  ;;  %p361_p10 = scmp.lt.s32.totalorder %s121_s6, %s359_s11 }
  0x1f   : > { %p356_p6 = pnand %p354_p5, %p342_p3  ;;  %p362_p12 = scmp.lt.s32.totalorder %s360_s0, %s353_s9 }
  0x21   : > { %p357_p7 = pneg %p356_p6  ;;  %p363_p4 = por %p362_p12, %p361_p10 }
  0x23   : > { %p364_p13 = pnand %p363_p4, %p357_p7 }
  0x25   : > { %367 = shalt.err (!%p364_p13)
}
  0x26   : > { %276 = dma.hbm_to_vmem [thread:$0]  (!%p544_p0), %s118_s4, 128, %s121_s6, %s109_s8  }
  0x27   : > { %p126_p11 = pnand %p262_p1, %p125_p2 }
  0x28   : > { %s559_s18 = sand.u32 (!%p126_p11), 1, %s434_s13  }
  0x29   : > { %129 = sbr.rel (%p126_p11) target bundleno = 73 (0x49), region = 24  ;;  %s263_s20 = sshll.u32 (!%p126_p11), %s559_s18, 3 }
  0x2a   : > { %s132_s21 = scalar_lea.sflag (!%p126_p11), [#allocation5], %s559_s18  ;;  %s135_s22 = scalar_lea.vmem (!%p126_p11), [#allocation4], %s263_s20 }
  0x2e   : > { %421 = dma.done.wait (%p520_p8), %s132_s21, 128  }
  0x2f   : > { %423 = vsyncadd (%p520_p8), %s132_s21, 4294967168  ;;  %s154_s27 = sld [smem:[#allocation3 + %s442_s15]]  ;;  %s153_s29 = scalar_lea.vmem [#allocation7], %s263_s20  ;;  %v157_v0 = vld [vmem:[%s135_s22] sm:$0xff] }
  0x30   : > { %s176_s30 = sshll.u32 %s153_s29, 4  ;;  %s266_s4 = sshll.u32 %s442_s15, 7  ;;  %s177_s30 = int_to_ptr.vmem [resolvable:$true] %s176_s30 }
  0x31   : > { %s174_s7 = scalar_lea.hbm %s610_s2, %s266_s4  ;;  %s162_s23 = scalar_lea.sflag [#allocation6], %s559_s18 }
  0x32   : > { %s368_s8 = scalar_lea.vmem %s177_s30, 128  ;;  %s454_s9 = smov [#allocation7]  }
  0x33   : > { %p369_p8 = scmp.ne.s32.totalorder %s177_s30, %s368_s8  ;;  %s372_s10 = sshll.u32 %s454_s9, 4  ;;  %s373_s10 = int_to_ptr.vmem [resolvable:$false] %s372_s10 }
  0x34   : > { %s374_s11 = scalar_lea.vmem %s373_s10, 256  ;;  %p375_p0 = scmp.lt.s32.totalorder %s177_s30, %s373_s10 }
  0x35   : > { %s155_s28 = scvt.s32.f32 %s154_s27  ;;  %p370_p11 = pnand %p369_p8, %p524_p9 }
  0x36   : > { %p376_p1 = scmp.lt.s32.totalorder %s374_s11, %s368_s8 }
  0x37   : > { %s156_s3 = smul.f32 1.3333334, %s155_s28  ;;  %p371_p12 = pneg %p370_p11 }
  0x38   : > { %p377_p2 = por %p376_p1, %p375_p0 }
  0x39   : > { %v158_v1 = vstv %s156_s3 }
  0x3a   : > { %v159_v2 = vmul.f32 %v158_v1, %v157_v0  ;;  %p378_p3 = pnand %p377_p2, %p371_p12 }
  0x3c   : > { %160 = vst [vmem:[%s153_s29] sm:$0xff] %v159_v2 }
  0x3d   : > { %381 = shalt.err (!%p378_p3)
}
  0x3e   : > { %s382_s15 = scalar_lea.hbm %s174_s7, 128  ;;  %s386_s20 = scalar_lea.hbm %s610_s2, 256 }
  0x3f   : > { %p383_p5 = scmp.ne.s32.totalorder %s174_s7, %s382_s15  ;;  %p387_p10 = scmp.lt.s32.totalorder %s174_s7, %s610_s2 }
  0x40   : > { %p388_p4 = scmp.lt.s32.totalorder %s386_s20, %s382_s15 }
  0x41   : > { %p384_p6 = pnand %p383_p5, %p524_p9 }
  0x42   : > { %p389_p13 = por %p388_p4, %p387_p10 }
  0x43   : > { %p385_p7 = pneg %p384_p6 }
  0x45   : > { %p390_p8 = pnand %p389_p13, %p385_p7 }
  0x47   : > { %393 = shalt.err (!%p390_p8)
}
  0x48   : > { %271 = dma.vmem_to_hbm [thread:$0]  (%p524_p9), %s177_s30, 128, %s174_s7, %s162_s23  }
  0x49 PF: > { %s188_s27 = sand.u32 1, %s430_s12   ;;  %p616_p11 = scmp.ne.s32.totalorder %s614_s26, 0 }
  0x4a   : > { %p617_p12 = scmp.ge.s32.totalorder %s450_s17, 2  ;;  %s189_s28 = scalar_lea.sflag [#allocation6], %s188_s27 }
  0x4c   : > { %p278_p0 = pnand %p617_p12, %p616_p11 }
  0x4e   : > { %p279_p1 = pneg %p278_p0 }
  0x50   : > { %425 = dma.done.wait (%p279_p1), %s189_s28, 128  }
  0x51   : > { %427 = vsyncadd (%p279_p1), %s189_s28, 4294967168  ;;  %s22_s17 = sadd.s32 1, %s450_s17   ;;  %s618_s12 = smov %s434_s13 }
  0x52   : > { %p19_p2 = scmp.ge.s32.totalorder %s22_s17, 4   ;;  %s619_s13 = smov %s438_s14 }
  0x53   : > { %s620_s14 = smov %s529_s25  ;;  %s621_s15 = smov %s446_s16 }
  0x54   : > { %s622_s16 = smov %s624_s19  ;;  %21 = sbr.rel (!%p19_p2) target bundleno = 11 (0xb), region = 69 }
  0x59   :  { %194 = vsyncpa [#allocation5], 1 }
  0x5a   :  { %196 = vsyncpa [#allocation5 + $0x1], 1 }
  0x5b   :  { %197 = vsyncpa [#allocation6], 1 }
  0x5c   :  { %199 = vsyncpa [#allocation6 + $0x1], 1 }

</bundles_post_ra>
